<compile_context>
chip_gen: v7x
topology: tpu7x:2x2x1
jax: 0.10.0
libtpu: 0.0.40
codegen_flags: <defaults>
</compile_context>

<pallas_src>
import jax
import jax.numpy as jnp
from jax import lax
from jax.experimental import pallas as pl
from jax.experimental.pallas import tpu as pltpu

PAD = 0  # onmt.Constants.PAD


# --------------------------------------------------------------------------
# Kernel 1: fused generator for ALL samples.
#   logits[v, n] = sum_h W[v, h] * x[n, h] + b[v]     (bf16 MXU, f32 acc)
#   logp[n]  = log_softmax(logits[:, n])[target[n]]   (zeroed for PAD / pad rows)
#   corr[n]  = (argmax_v logits[v, n] == target[n])   (zeroed for PAD / pad rows)
# Tokens live on the lane axis, so every output store is an unmasked,
# lane-dense (1, tm) vector store.
# --------------------------------------------------------------------------
def _generator_kernel(w_ref, x_ref, b_ref, t_ref, m_ref, logp_ref, corr_ref):
    # w: (V, H) bf16 (resident across the grid), x: (tm, H) bf16,
    # b: (V, 1) f32, t/m: (1, tm).  logits: (V, tm) f32.
    logits = lax.dot_general(
        w_ref[...], x_ref[...],
        dimension_numbers=(((1,), (1,)), ((), ())),       # W @ x^T  (trans_b)
        preferred_element_type=jnp.float32) + b_ref[...]
    col_max = jnp.max(logits, axis=0, keepdims=True)                  # (1, tm)
    lse = jnp.log(jnp.sum(jnp.exp(logits - col_max), axis=0,
                          keepdims=True)) + col_max                   # (1, tm)
    vocab = lax.broadcasted_iota(jnp.int32, logits.shape, 0)          # (V, tm)
    onehot = vocab == t_ref[...]
    logit_at_t = jnp.sum(jnp.where(onehot, logits, 0.0), axis=0,
                         keepdims=True)                               # (1, tm)
    mask = m_ref[...]                                                 # (1, tm)
    logp_ref[...] = mask * (logit_at_t - lse)
    # argmax == target  <=>  target logit is the column max.  Exact ties count
    # as correct (torch argmax would pick a single index) — differs only on
    # exact float ties.
    corr_ref[...] = mask * (logit_at_t >= col_max).astype(jnp.float32)


def generator_scores(x_flat, w_vh, b_v1, targets_flat, nonpad_flat, *, tm=256):
    """x_flat: (N, H) bf16-castable, w_vh: (V, H) bf16, b_v1: (V, 1) f32,
    targets_flat/nonpad_flat: (N,).  Returns per-token (logp, correct)."""
    N, H = x_flat.shape
    V = w_vh.shape[0]
    n_tiles = pl.cdiv(N, tm)
    n_pad = n_tiles * tm
    pad = n_pad - N
    x_p = jnp.pad(x_flat.astype(jnp.bfloat16), ((0, pad), (0, 0)))
    t_p = jnp.pad(targets_flat.astype(jnp.int32), (0, pad)).reshape(1, n_pad)
    m_p = jnp.pad(nonpad_flat.astype(jnp.float32), (0, pad)).reshape(1, n_pad)

    # TODO(synk): for realistic vocab sizes (V*H won't fit VMEM, esp. v7x's
    # 64 MiB) add a V-reduction grid axis with an online-LSE accumulator.
    logp, corr = pl.pallas_call(
        _generator_kernel,
        out_shape=(jax.ShapeDtypeStruct((1, n_pad), jnp.float32),
                   jax.ShapeDtypeStruct((1, n_pad), jnp.float32)),
        grid=(n_tiles,),
        in_specs=[pl.BlockSpec((V, H), lambda i: (0, 0)),   # weight resident
                  pl.BlockSpec((tm, H), lambda i: (i, 0)),
                  pl.BlockSpec((V, 1), lambda i: (0, 0)),
                  pl.BlockSpec((1, tm), lambda i: (0, i)),
                  pl.BlockSpec((1, tm), lambda i: (0, i))],
        out_specs=(pl.BlockSpec((1, tm), lambda i: (0, i)),
                   pl.BlockSpec((1, tm), lambda i: (0, i))),
        compiler_params=pltpu.CompilerParams(
            dimension_semantics=("parallel",),
            vmem_limit_bytes=64 * 1024 * 1024),
    )(w_vh, x_p, b_v1, t_p, m_p)
    return logp[0, :N], corr[0, :N]


# --------------------------------------------------------------------------
# Kernel 2: per-example Gaussian KLD for ALL samples in one launch.
#   kld = 0.5*(exp(2*sigma) + mu^2) - sigma - 0.5 ; positions >= k -> 0
#   mu/sigma flattened to (S*B, L, D), k to (S*B, 1, 1).
# --------------------------------------------------------------------------
def _kld_kernel(mu_ref, sig_ref, k_ref, out_ref):
    mu = mu_ref[...]                                  # (SB, L, D)
    sig = sig_ref[...]
    kld = 0.5 * (jnp.exp(2.0 * sig) + mu * mu) - sig - 0.5
    pos = lax.broadcasted_iota(jnp.int32, kld.shape, 1)
    kld = jnp.where(pos >= k_ref[...], 0.0, kld)      # mask positions >= k
    s = jnp.sum(kld, axis=2)                          # (SB, L)
    out_ref[...] = jnp.sum(s, axis=1, keepdims=True)  # (SB, 1)


def kld_per_example_all(mu_all, sigma_all, k_all):
    SB = mu_all.shape[0]
    out = pl.pallas_call(
        _kld_kernel,
        out_shape=jax.ShapeDtypeStruct((SB, 1), jnp.float32),
    )(mu_all, sigma_all, k_all.reshape(SB, 1, 1).astype(jnp.int32))
    return out[:, 0]


# --------------------------------------------------------------------------
# Length-distribution KL vs. geometric prior: tiny -> plain jnp (XLA fuses it;
# a pallas launch here is pure overhead).  Guarded against pi == 0.
# --------------------------------------------------------------------------
def kld_length(pi, prior_len):
    log_pi = jnp.log(jnp.where(pi > 0, pi, 1.0))
    val = pi * (log_pi - jnp.log(prior_len))
    return val.sum(axis=1).mean()      # == (pi*log(pi/prior)).mean(0).sum()


# --------------------------------------------------------------------------
# Forward pass (semantics of Loss.forward)
# --------------------------------------------------------------------------
def loss_forward(outputs, mu, sigma, pi, k, targets, baseline,
                 gen_w, gen_b, prior_len, *,
                 kl_weight=1.0, lam=0.1, sample=2, r_mean=0.0, training=True):
    S, B, T, H = outputs.shape
    assert S == sample
    V = gen_w.shape[1]
    L, D = mu.shape[2], mu.shape[3]

    kld_len = kld_length(pi, prior_len)
    loss = kl_weight * kld_len / B
    loss_report = kl_weight * kld_len

    # ---- Gaussian KL for every sample: ONE pallas_call ---------------------
    kld_sb = kld_per_example_all(mu.reshape(S * B, L, D),
                                 sigma.reshape(S * B, L, D),
                                 k.reshape(S * B)).reshape(S, B)

    # ---- generator log-likelihood for every sample: ONE pallas_call --------
    x_all = outputs.reshape(S * B * T, H)
    t_all = jnp.broadcast_to(targets, (S, B, T)).reshape(S * B * T)
    nonpad = (t_all != PAD)
    w_vh = gen_w.T.astype(jnp.bfloat16)               # (V, H) MXU operand
    b_v1 = gen_b.reshape(V, 1).astype(jnp.float32)
    logp_flat, corr_flat = generator_scores(x_all, w_vh, b_v1, t_all, nonpad,
                                            tm=256)
    pty_sb = logp_flat.reshape(S, B, T).sum(axis=2)   # (S, B) masked log-lik
    num_correct = corr_flat.sum() / sample

    r = pty_sb - kl_weight * kld_sb                   # (S, B)
    loss = loss - r.mean()                            # == sum_i r_i.mean()/S
    loss_report = loss_report - lax.stop_gradient(r).sum() / sample

    elbo = -lax.stop_gradient(loss)
    if not training:
        return elbo, loss_report

    # ---- REINFORCE for the discrete length variable (vectorized over S) ----
    bl = lax.stop_gradient(baseline)[None, :]                      # (1, B)
    r_det = lax.stop_gradient(r)                                   # (S, B)
    idx = (k - 1).astype(jnp.int32)                                # (S, B)
    pi_at_k = pi[jnp.arange(B)[None, :], idx]                      # (S, B)
    reinforcement = lam * (r_det - r_mean - bl) * jnp.log(pi_at_k)
    loss = loss - reinforcement.mean()

    r_avg = r_det.mean(axis=0)                                     # (B,)
    loss_bl = jnp.mean((r_avg - baseline - r_mean) ** 2)

    # TODO(synk): log_value telemetry (E_pi, mean_sigma, KL variance) and the
    # stateful moving average self.r_mean are host-side logging/state, omitted.
    return loss, loss_bl, loss_report, num_correct


# --------------------------------------------------------------------------
if __name__ == "__main__":
    key = jax.random.PRNGKey(0)
    S, B, T, H, V = 2, 2, 8, 32, 128          # samples, batch, tgt len, hidden, vocab
    L, D, MAX_LEN = 8, 16, 8                  # latent len, latent dim, max_len_latent
    gamma, lam = 0.9, 0.1

    ks = jax.random.split(key, 8)
    outputs = jax.random.normal(ks[0], (S, B, T, H), jnp.float32)
    mu = 0.5 * jax.random.normal(ks[1], (S, B, L, D), jnp.float32)
    sigma = 0.1 * jax.random.normal(ks[2], (S, B, L, D), jnp.float32)
    pi = jax.nn.softmax(jax.random.normal(ks[3], (B, MAX_LEN), jnp.float32), axis=-1)
    # sampled latent lengths
    k = jnp.array([[L, L // 2], [L - 2, L]], dtype=jnp.int32)      # (S, B)
    targets = jax.random.randint(ks[4], (B, T), 0, V).astype(jnp.int32)
    targets = targets.at[:, -1].set(PAD)                           # ensure PAD positions
    baseline = jax.random.normal(ks[5], (B,), jnp.float32)

    # Generator params (Linear(H, V) + LogSoftmax); W kept as (H, V)
    gen_w = (jax.random.normal(ks[6], (H, V), jnp.float32) / jnp.sqrt(H)).astype(jnp.float32)
    gen_b = jnp.zeros((V,), jnp.float32)

    # prior_len[j] = gamma^(j+1), normalized (matches the __init__ loop)
    prior = gamma ** jnp.arange(1, MAX_LEN + 1, dtype=jnp.float32)
    prior_len = (prior / prior.sum())[None, :]                     # (1, MAX_LEN)

    loss, loss_bl, loss_report, num_correct = loss_forward(
        outputs, mu, sigma, pi, k, targets, baseline, gen_w, gen_b, prior_len,
        kl_weight=1.0, lam=lam, sample=S, r_mean=0.0, training=True)

    jax.block_until_ready((loss, loss_bl, loss_report, num_correct))
    print("KERNEL_OK")
</pallas_src>

<mosaic_0001>
module attributes {stable_mosaic.version = 11 : i64} {
  func.func @_kld_kernel(%arg0: memref<4x8x16xf32, #tpu.memory_space<vmem>>, %arg1: memref<4x8x16xf32, #tpu.memory_space<vmem>>, %arg2: memref<4x1x1xi32, #tpu.memory_space<vmem>>, %arg3: memref<4x1xf32, #tpu.memory_space<vmem>>) attributes {dimension_semantics = [], scalar_prefetch = 0 : i64, scratch_operands = 0 : i64, tpu.core_type = #tpu.core_type<tc>} {
    %c0 = arith.constant 0 : index
    %c0_0 = arith.constant 0 : index
    %c0_1 = arith.constant 0 : index
    %0 = vector.load %arg0[%c0, %c0_0, %c0_1] : memref<4x8x16xf32, #tpu.memory_space<vmem>>, vector<4x8x16xf32>
    %c0_2 = arith.constant 0 : index
    %c0_3 = arith.constant 0 : index
    %c0_4 = arith.constant 0 : index
    %1 = vector.load %arg1[%c0_2, %c0_3, %c0_4] : memref<4x8x16xf32, #tpu.memory_space<vmem>>, vector<4x8x16xf32>
    %cst = arith.constant 2.000000e+00 : f32
    %2 = vector.broadcast %cst : f32 to vector<4x8x16xf32>
    %3 = arith.mulf %2, %1 : vector<4x8x16xf32>
    %4 = math.exp %3 : vector<4x8x16xf32>
    %5 = arith.mulf %0, %0 : vector<4x8x16xf32>
    %6 = arith.addf %4, %5 : vector<4x8x16xf32>
    %cst_5 = arith.constant 5.000000e-01 : f32
    %7 = vector.broadcast %cst_5 : f32 to vector<4x8x16xf32>
    %8 = arith.mulf %7, %6 : vector<4x8x16xf32>
    %9 = arith.subf %8, %1 : vector<4x8x16xf32>
    %cst_6 = arith.constant 5.000000e-01 : f32
    %10 = vector.broadcast %cst_6 : f32 to vector<4x8x16xf32>
    %11 = arith.subf %9, %10 : vector<4x8x16xf32>
    %12 = tpu.iota {dimensions = array<i32: 1>} : vector<4x8x16xi32>
    %c0_7 = arith.constant 0 : index
    %c0_8 = arith.constant 0 : index
    %c0_9 = arith.constant 0 : index
    %13 = vector.load %arg2[%c0_7, %c0_8, %c0_9] : memref<4x1x1xi32, #tpu.memory_space<vmem>>, vector<4x1x1xi32>
    %14 = vector.broadcast %13 : vector<4x1x1xi32> to vector<4x8x16xi32>
    %15 = arith.cmpi sge, %12, %14 : vector<4x8x16xi32>
    %cst_10 = arith.constant 0.000000e+00 : f32
    %16 = vector.broadcast %cst_10 : f32 to vector<4x8x16xf32>
    %17 = arith.select %15, %16, %11 : vector<4x8x16xi1>, vector<4x8x16xf32>
    %cst_11 = arith.constant dense<0.000000e+00> : vector<4x8xf32>
    %18 = vector.multi_reduction <add>, %17, %cst_11 [2] : vector<4x8x16xf32> to vector<4x8xf32>
    %cst_12 = arith.constant dense<0.000000e+00> : vector<4xf32>
    %19 = vector.multi_reduction <add>, %18, %cst_12 [1] : vector<4x8xf32> to vector<4xf32>
    %20 = vector.shape_cast %19 : vector<4xf32> to vector<4x1xf32>
    %c0_13 = arith.constant 0 : index
    %c0_14 = arith.constant 0 : index
    %21 = vector.load %arg3[%c0_13, %c0_14] : memref<4x1xf32, #tpu.memory_space<vmem>>, vector<4x1xf32>
    tpu.vector_store %arg3[%c0_13, %c0_14], %20 {strides = array<i32>} : memref<4x1xf32, #tpu.memory_space<vmem>>, vector<4x1xf32>,
    return
  }
}

</mosaic_0001>

<bundles_post_ra>
// kernel: tpu_custom_call.1
= control target key start
LH: loop header
LB: loop body
LE: loop exit
PB: predicated region body
PF: predicated region fallthrough
CT: control target
= control target key end

     0   :  { %8 = vsyncpa [#allocation3], 0  ;;  %s317_s0 = inlined_call_operand.hbm [shape: f32[4,8,16], index: 0, kind: input, shape index: {}]   ;;  %s318_s1 = inlined_call_operand.hbm [shape: f32[4,8,16], index: 1, kind: input, shape index: {}]   ;;  %s319_s2 = inlined_call_operand.vmem [shape: s32[4,1,1], index: 2, kind: input, shape index: {}]   ;;  %s320_s3 = inlined_call_operand.vmem [shape: f32[4,1], index: 3, kind: output, shape index: {}]  }
   0x1   :  { %9 = vsyncpa [#allocation5], 0  ;;  %s249_s12 = smov [#allocation2]   ;;  %s201_s16 = scalar_lea.hbm %s317_s0, 512 }
   0x2   :  { %s15_s13 = sshll.u32 %s249_s12, 4  ;;  %p202_p0 = scmp.ne.s32.totalorder %s317_s0, %s201_s16  ;;  %s16_s13 = int_to_ptr.vmem [resolvable:$true] %s15_s13 }
   0x3   :  { %p205_p1 = scmp.lt.u32.totalorder %s201_s16, %s317_s0 }
   0x5   :  { %p207_p2 = pnand %p205_p1, %p202_p0 }
   0x7   :  { %210 = shalt.err (!%p207_p2)
}
   0x8   :  { %s211_s21 = scalar_lea.vmem %s16_s13, 512  ;;  %p216_p4 = scmp.lt.s32.totalorder %s16_s13, %s16_s13 }
   0x9   :  { %p212_p3 = scmp.ne.s32.totalorder %s16_s13, %s211_s21  ;;  %p217_p5 = scmp.lt.s32.totalorder %s211_s21, %s211_s21 }
   0xb   :  { %p218_p6 = por %p217_p5, %p216_p4 }
   0xd   :  { %p219_p7 = pnand %p218_p6, %p212_p3 }
   0xf   :  { %222 = shalt.err (!%p219_p7)
}
  0x10   :  { %s250_s22 = smov 128   ;;  %s251_s23 = smov 8  }
  0x11   :  { %21 = dma.hbm_to_vmem [thread:$0]  %s317_s0, 512, %s16_s13, [#allocation3], %s250_s22, %s250_s22, %s251_s23  }
  0x12   :  { %s252_s26 = smov [#allocation4]   ;;  %s223_s30 = scalar_lea.hbm %s318_s1, 512 }
  0x13   :  { %s27_s27 = sshll.u32 %s252_s26, 4  ;;  %p224_p8 = scmp.ne.s32.totalorder %s318_s1, %s223_s30  ;;  %s28_s27 = int_to_ptr.vmem [resolvable:$true] %s27_s27 }
  0x14   :  { %p227_p9 = scmp.lt.u32.totalorder %s223_s30, %s318_s1 }
  0x16   :  { %p229_p10 = pnand %p227_p9, %p224_p8 }
  0x18   :  { %232 = shalt.err (!%p229_p10)
}
  0x19   :  { %s233_s8 = scalar_lea.vmem %s28_s27, 512  ;;  %p238_p12 = scmp.lt.s32.totalorder %s28_s27, %s28_s27 }
  0x1a   :  { %p234_p11 = scmp.ne.s32.totalorder %s28_s27, %s233_s8  ;;  %p239_p13 = scmp.lt.s32.totalorder %s233_s8, %s233_s8 }
  0x1c   :  { %p240_p0 = por %p239_p13, %p238_p12 }
  0x1e   :  { %p241_p1 = pnand %p240_p0, %p234_p11 }
  0x20   :  { %244 = shalt.err (!%p241_p1)
}
  0x21   :  { %33 = dma.hbm_to_vmem [thread:$0]  %s318_s1, 512, %s28_s27, [#allocation5], %s250_s22, %s250_s22, %s251_s23  }
  0x22   :  { %245 = dma.done.wait [#allocation3], 512  }
  0x23   :  { %246 = vsyncadd [#allocation3], 4294966784 }
  0x24   :  { %247 = dma.done.wait [#allocation5], 512  }
  0x25   :  { %248 = vsyncadd [#allocation5], 4294966784  ;;  %v253_v0 = vmov 0   ;;  %v184_v1 = vld [vmem:[%s319_s2 + $0x2] ss:$0 sm:$0xff]  ;;  %v48_v6 = vld [vmem:[#allocation4 + $0x10] sm:$0xff]  ;;  %v82_v35 = vlaneseq }
  0x26   :  { %192 = vset.pattern.permute.xlu1 %v253_v0  ;;  %191 = vset.pattern.permute.xlu0 %v253_v0  ;;  %v182_v2 = vld [vmem:[%s319_s2] ss:$0 sm:$0xff]  ;;  %v185_v3 = vld [vmem:[%s319_s2 + $0x3] ss:$0 sm:$0xff]  ;;  %v183_v4 = vld [vmem:[%s319_s2 + $0x1] ss:$0 sm:$0xff] }
  0x27   :  { %111 = vperm.xlu1 %192, %v184_v1   ;;  %105 = vperm.xlu0 %191, %v182_v2   ;;  %v46_v5 = vld [vmem:[#allocation4] sm:$0xff]  ;;  %v52_v8 = vmul.f32 2.0, %v48_v6  ;;  %v47_v9 = vld [vmem:[#allocation4 + $0x8] sm:$0xff]  ;;  %v49_v11 = vld [vmem:[#allocation4 + $0x18] sm:$0xff]  ;;  %v83_v40 = vshrl.u32 %v82_v35, 7  ;;  %vm124_vm0 = vcmask 130048  }
  0x28   :  { %v50_v7 = vmul.f32 2.0, %v46_v5  ;;  %v51_v12 = vmul.f32 2.0, %v47_v9  ;;  %v53_v14 = vmul.f32 2.0, %v49_v11  ;;  %v42_v17 = vld [vmem:[#allocation2] sm:$0xff]  ;;  %v44_v18 = vld [vmem:[#allocation2 + $0x10] sm:$0xff]  ;;  %v43_v23 = vld [vmem:[#allocation2 + $0x8] sm:$0xff] }
  0x29   :  { %v58_v13 = vmul.f32 1.442695, %v52_v8  ;;  %v62_v20 = vmul.f32 %v42_v17, %v42_v17  ;;  %v64_v21 = vmul.f32 %v44_v18, %v44_v18  ;;  %v45_v24 = vld [vmem:[#allocation2 + $0x18] sm:$0xff]  ;;  %v63_v26 = vmul.f32 %v43_v23, %v43_v23 }
  0x2a   :  { %v54_v10 = vmul.f32 1.442695, %v50_v7  ;;  %v56_v15 = vmul.f32 1.442695, %v51_v12  ;;  %v60_v16 = vmul.f32 1.442695, %v53_v14  ;;  %v65_v29 = vmul.f32 %v45_v24, %v45_v24 }
  0x2b   :  { %114 = vperm.xlu1 %192, %v185_v3   ;;  %108 = vperm.xlu0 %191, %v183_v4   ;;  %v142_v59 = vand.u32 127, %v82_v35  ;;  %vm159_vm5 = vcmask 1041409   ;;  %vm161_vm6 = vcmask 1042434   ;;  %vm163_vm7 = vcmask 1043459  }
  0x2c   :  { %193 = vpow2.f32 %v54_v10  ;;  %vm166_vm8 = vcmask 60416   ;;  %vm170_vm9 = vcmask 3072  }
  0x2d   :  { %195 = vpow2.f32 %v58_v13  ;;  %v145_v61 = vsub.s32 %v142_v59, %v83_v40 }
  0x2e   :  { %197 = vpow2.f32 %v56_v15 }
  0x2f   :  { %199 = vpow2.f32 %v60_v16 }
  0x36   :  { %v194_v19 = vpop.eup %193 }
  0x37   :  { %v196_v22 = vpop.eup %195  ;;  %v66_v25 = vadd.f32 %v194_v19, %v62_v20 }
  0x38   :  { %v68_v27 = vadd.f32 %v196_v22, %v64_v21  ;;  %v198_v28 = vpop.eup %197 }
  0x39   :  { %v200_v30 = vpop.eup %199  ;;  %v70_v31 = vmul.f32 0.5, %v66_v25  ;;  %v67_v32 = vadd.f32 %v198_v28, %v63_v26 }
  0x3a   :  { %v72_v33 = vmul.f32 0.5, %v68_v27  ;;  %v69_v34 = vadd.f32 %v200_v30, %v65_v29 }
  0x3b   :  { %v74_v36 = vsub.f32 %v70_v31, %v46_v5  ;;  %v71_v37 = vmul.f32 0.5, %v67_v32 }
  0x3c   :  { %v76_v38 = vsub.f32 %v72_v33, %v48_v6  ;;  %v73_v39 = vmul.f32 0.5, %v69_v34 }
  0x3d   :  { %v178_v41 = vadd.f32 -0.5, %v74_v36  ;;  %v75_v42 = vsub.f32 %v71_v37, %v47_v9 }
  0x3e   :  { %v180_v43 = vadd.f32 -0.5, %v76_v38  ;;  %v77_v46 = vsub.f32 %v73_v39, %v49_v11 }
  0x3f   :  { %v179_v48 = vadd.f32 -0.5, %v75_v42 }
  0x40   :  { %v181_v53 = vadd.f32 -0.5, %v77_v46 }
  0xa6   :  { %v112_v44 = vpop.permute.xlu1 %111  ;;  %v106_v45 = vpop.permute.xlu0 %105 }
  0xa7   :  { %vm118_vm1 = vcmp.ge.s32.totalorder %v83_v40, %v112_v44  ;;  %vm116_vm2 = vcmp.ge.s32.totalorder %v83_v40, %v106_v45 }
  0xa8   :  { %v120_v47 = vsel %vm116_vm2, 0.0, %v178_v41  ;;  %v122_v49 = vsel %vm118_vm1, 0.0, %v180_v43 }
  0xa9   :  { %v125_v50 = vsel %vm124_vm0, %v120_v47, 0.0  ;;  %v131_v54 = vsel %vm124_vm0, %v122_v49, 0.0 }
  0xaa   :  { %v115_v51 = vpop.permute.xlu1 %114  ;;  %v109_v52 = vpop.permute.xlu0 %108  ;;  %126 = vadd.xlane.f32.xlu0 %v125_v50 }
  0xab   :  { %vm119_vm3 = vcmp.ge.s32.totalorder %v83_v40, %v115_v51  ;;  %vm117_vm4 = vcmp.ge.s32.totalorder %v83_v40, %v109_v52 }
  0xac   :  { %v121_v55 = vsel %vm117_vm4, 0.0, %v179_v48  ;;  %v123_v57 = vsel %vm119_vm3, 0.0, %v181_v53 }
  0xad   :  { %v128_v56 = vsel %vm124_vm0, %v121_v55, 0.0  ;;  %v134_v58 = vsel %vm124_vm0, %v123_v57, 0.0 }
  0xae   :  { %129 = vadd.xlane.f32.xlu1 %v128_v56  ;;  %132 = vadd.xlane.f32.xlu0 %v131_v54 }
  0xb2   :  { %135 = vadd.xlane.f32.xlu0 %v134_v58 }
 0x137   :  { %v127_v60 = vpop.xlane.xlu0 %126 }
 0x138   :  { %v146_v0 = vrot.slane %v127_v60, %v145_v61 }
 0x13b   :  { %v130_v62 = vpop.xlane.xlu1 %129  ;;  %v133_v63 = vpop.xlane.xlu0 %132 }
 0x13c   :  { %v150_v1 = vrot.slane %v130_v62, %v145_v61  ;;  %v154_v2 = vrot.slane %v133_v63, %v145_v61 }
 0x13e   :  { %v160_v3 = vsel %vm159_vm5, %v150_v1, %v146_v0 }
 0x13f   :  { %v136_v4 = vpop.xlane.xlu0 %135  ;;  %v162_v6 = vsel %vm161_vm6, %v154_v2, %v160_v3 }
 0x140   :  { %v158_v5 = vrot.slane %v136_v4, %v145_v61 }
 0x142   :  { %v164_v7 = vsel %vm163_vm7, %v158_v5, %v162_v6 }
 0x143   :  { %v167_v8 = vsel %vm166_vm8, %v164_v7, 0.0 }
 0x144   :  { %168 = vadd.xlane.f32.xlu1 %v167_v8 }
 0x1d1   :  { %v169_v9 = vpop.xlane.xlu1 %168 }
 0x1d2   :  { %171 = vst.msk [vmem:[%s320_s3] sm:$0xf] %vm170_vm9, %v169_v9 }
 0x1d3   :  { %176 = vsyncpa [#allocation3], 1 }
 0x1d4   :  { %177 = vsyncpa [#allocation5], 1 }

</bundles_post_ra>
